<compile_context>
chip_gen: v7x
topology: tpu7x:2x2x1
jax: 0.10.0
libtpu: 0.0.40
codegen_flags: <defaults>
</compile_context>

<pallas_src>
import functools

import jax
import jax.numpy as jnp
from jax import lax
from jax.experimental import pallas as pl
from jax.experimental.pallas import tpu as pltpu

LANES = 128
SUBLANES = 8
ACC_ROWS = 32   # accumulator rows per core: 4 independent vreg add chains


def _gray_loss_kernel(x_ref, out_ref, *, rows_total, row_tile, acc_rows,
                      steps_per_core, needs_mask):
    c = pl.program_id(0)   # core-split axis
    i = pl.program_id(1)   # reduction axis ("arbitrary")

    @pl.when(i == 0)
    def _():
        out_ref[...] = jnp.zeros_like(out_ref)

    x = x_ref[...].astype(jnp.float32)

    def _accumulate(contrib):
        # Reduce the tile into an (acc_rows, 128) slab with pure VPU vreg adds;
        # acc_rows/8 independent chains keep the adds pipelined under the DMA.
        partial = contrib.reshape(row_tile // acc_rows, acc_rows, LANES).sum(axis=0)
        out_ref[...] += partial.reshape(1, acc_rows, LANES)

    if not needs_mask:
        # Static fast path: every tile is full -> no iota/compare/select emitted.
        _accumulate(jnp.abs(x - 0.5))
    else:
        # Unclamped global step -> how many rows of this tile are real data.
        global_step = c * steps_per_core + i
        valid_rows = rows_total - global_step * row_tile
        is_full = valid_rows >= row_tile

        @pl.when(is_full)
        def _():
            _accumulate(jnp.abs(x - 0.5))

        @pl.when(jnp.logical_not(is_full))
        def _():
            # Masked slow path: covers the ragged last tile and fully
            # out-of-range (clamped) padded steps (valid_rows <= 0).
            # Keep the select (NOT multiply-by-mask): padded-region garbage may
            # be NaN/Inf and must be discarded, not scaled.
            row_ids = lax.broadcasted_iota(jnp.int32, (row_tile, LANES), 0)
            contrib = jnp.where(row_ids < valid_rows, jnp.abs(x - 0.5), 0.0)
            _accumulate(contrib)


def gray_loss(x, *, row_tile=4096, num_cores=1, core_parallel=False):
    """1 / mean(|x - 0.5|) over all elements of x (any shape, any float dtype).

    row_tile:      rows of the (rows, 128) view processed per grid step.
                   4096 rows = 2 MiB f32 / 1 MiB bf16 per buffer (x2 for double
                   buffering).  Safe up to ~8192 on v5e's 16 MiB scoped VMEM
                   default, ~16384 on v6e/v7x (keep <24 MiB total on v7x).
    num_cores:     leading grid-axis split.  Leave at 1 on single-TC v5e/v6e.
    core_parallel: on v7x, set num_cores=2, core_parallel=True so the leading
                   axis is sharded across the two TensorCores.
    """
    n = x.size
    flat = x.reshape(-1)                      # free (contiguous)
    n_main = (n // LANES) * LANES
    rows = n_main // LANES

    # Tiny tail (< 128 elements) handled in plain JAX -- negligible work.
    tail = flat[n_main:]
    tail_sum = jnp.sum(jnp.abs(tail.astype(jnp.float32) - 0.5))

    if rows == 0:
        # NOTE: n == 0 -> 0/0 = NaN, matching PyTorch's mean of an empty tensor.
        return jnp.float32(n) / tail_sum

    x2d = flat[:n_main].reshape(rows, LANES)  # no-op slice when n % 128 == 0

    # --- tile sizing (all Python ints at trace time) -----------------------
    row_cap = pl.cdiv(rows, SUBLANES) * SUBLANES      # rows rounded up to 8
    row_tile = min(row_tile, row_cap)
    acc_rows = ACC_ROWS if row_tile >= ACC_ROWS else SUBLANES
    row_tile = max(acc_rows, (row_tile // acc_rows) * acc_rows)

    steps_total = pl.cdiv(rows, row_tile)
    num_cores = max(1, min(num_cores, steps_total))
    steps_per_core = pl.cdiv(steps_total, num_cores)
    last_block = steps_total - 1

    # Trace-time raggedness check: mask code is only emitted when needed
    # (ragged last tile and/or padded per-core steps).
    needs_mask = (num_cores * steps_per_core * row_tile) != rows

    if num_cores * steps_per_core == steps_total:
        # No padded steps -> no clamp in the index_map.
        index_map = lambda c, i: (c * steps_per_core + i, 0)
    else:
        # Clamp padded steps onto the last real block; masked to 0 in-kernel.
        index_map = lambda c, i: (jnp.minimum(c * steps_per_core + i, last_block), 0)

    kernel = functools.partial(
        _gray_loss_kernel,
        rows_total=rows,
        row_tile=row_tile,
        acc_rows=acc_rows,
        steps_per_core=steps_per_core,
        needs_mask=needs_mask,
    )

    itemsize = jnp.dtype(x.dtype).itemsize
    cost = pl.CostEstimate(
        flops=3 * n_main,                     # sub + abs + accumulate per element
        transcendentals=0,
        bytes_accessed=n_main * itemsize + num_cores * acc_rows * LANES * 4,
    )

    dim_sems = ((pltpu.CORE_PARALLEL, pltpu.ARBITRARY) if core_parallel
                else ("parallel", "arbitrary"))

    partials = pl.pallas_call(
        kernel,
        out_shape=jax.ShapeDtypeStruct((num_cores, acc_rows, LANES), jnp.float32),
        grid_spec=pltpu.PrefetchScalarGridSpec(
            num_scalar_prefetch=0,
            grid=(num_cores, steps_per_core),
            in_specs=[pl.BlockSpec((row_tile, LANES), index_map)],
            out_specs=pl.BlockSpec((1, acc_rows, LANES), lambda c, i: (c, 0, 0)),
        ),
        compiler_params=pltpu.CompilerParams(dimension_semantics=dim_sems),
        cost_estimate=cost,
    )(x2d)

    total = jnp.sum(partials) + tail_sum
    return jnp.float32(n) / total             # 1 / mean == N / sum


if __name__ == "__main__":
    key = jax.random.PRNGKey(0)
    # NCHW input, small image-like tensor.
    x = jax.random.uniform(key, (2, 4, 16, 16), dtype=jnp.float32)

    result = jax.block_until_ready(gray_loss(x))

    # Pure-JAX reference check.
    ref = 1.0 / jnp.mean(jnp.abs(x - 0.5))
    assert jnp.allclose(result, ref, rtol=1e-5, atol=1e-5), (result, ref)

    print("KERNEL_OK")
</pallas_src>

<mosaic_0001>
module attributes {stable_mosaic.version = 11 : i64} {
  func.func @_gray_loss_kernel(%arg0: i32, %arg1: i32, %arg2: memref<16x128xf32, #tpu.memory_space<vmem>>, %arg3: memref<1x8x128xf32, #tpu.memory_space<vmem>>) attributes {dimension_semantics = [#tpu.dimension_semantics<parallel>, #tpu.dimension_semantics<arbitrary>], iteration_bounds = array<i64: 1, 1>, scalar_prefetch = 0 : i64, scratch_operands = 0 : i64, tpu.core_type = #tpu.core_type<tc>, window_params = [{transform_indices = @transform_0, window_bounds = array<i64: 16, 128>}, {transform_indices = @transform_1, window_bounds = array<i64: 1, 8, 128>}]} {
    %c0_i32 = arith.constant 0 : i32
    %0 = arith.cmpi eq, %arg1, %c0_i32 : i32
    %1 = arith.extui %0 : i1 to i32
    %c0_i32_0 = arith.constant 0 : i32
    %2 = arith.cmpi ne, %1, %c0_i32_0 : i32
    scf.if %2 {
      %cst_9 = arith.constant 0.000000e+00 : f32
      %13 = vector.broadcast %cst_9 : f32 to vector<1x8x128xf32>
      %c0_10 = arith.constant 0 : index
      %c0_11 = arith.constant 0 : index
      %c0_12 = arith.constant 0 : index
      %14 = vector.load %arg3[%c0_10, %c0_11, %c0_12] : memref<1x8x128xf32, #tpu.memory_space<vmem>>, vector<1x8x128xf32>
      tpu.vector_store %arg3[%c0_10, %c0_11, %c0_12], %13 {strides = array<i32>} : memref<1x8x128xf32, #tpu.memory_space<vmem>>, vector<1x8x128xf32>,
    } else {
    }
    %c0 = arith.constant 0 : index
    %c0_1 = arith.constant 0 : index
    %3 = vector.load %arg2[%c0, %c0_1] : memref<16x128xf32, #tpu.memory_space<vmem>>, vector<16x128xf32>
    %cst = arith.constant 5.000000e-01 : f32
    %4 = vector.broadcast %cst : f32 to vector<16x128xf32>
    %5 = arith.subf %3, %4 : vector<16x128xf32>
    %6 = math.absf %5 : vector<16x128xf32>
    %7 = vector.shape_cast %6 : vector<16x128xf32> to vector<2x8x128xf32>
    %cst_2 = arith.constant dense<0.000000e+00> : vector<8x128xf32>
    %8 = vector.multi_reduction <add>, %7, %cst_2 [0] : vector<2x8x128xf32> to vector<8x128xf32>
    %c0_3 = arith.constant 0 : index
    %c0_4 = arith.constant 0 : index
    %c0_5 = arith.constant 0 : index
    %9 = vector.load %arg3[%c0_3, %c0_4, %c0_5] : memref<1x8x128xf32, #tpu.memory_space<vmem>>, vector<1x8x128xf32>
    %10 = vector.shape_cast %8 : vector<8x128xf32> to vector<1x8x128xf32>
    %11 = arith.addf %9, %10 : vector<1x8x128xf32>
    %c0_6 = arith.constant 0 : index
    %c0_7 = arith.constant 0 : index
    %c0_8 = arith.constant 0 : index
    %12 = vector.load %arg3[%c0_6, %c0_7, %c0_8] : memref<1x8x128xf32, #tpu.memory_space<vmem>>, vector<1x8x128xf32>
    tpu.vector_store %arg3[%c0_6, %c0_7, %c0_8], %11 {strides = array<i32>} : memref<1x8x128xf32, #tpu.memory_space<vmem>>, vector<1x8x128xf32>,
    return
  }
  func.func @transform_0(%arg0: i32, %arg1: i32) -> (i32, i32) {
    %c1_i32 = arith.constant 1 : i32
    %0 = arith.muli %arg0, %c1_i32 : i32
    %1 = arith.addi %0, %arg1 : i32
    %c0_i32 = arith.constant 0 : i32
    %c0_i32_0 = arith.constant 0 : i32
    return %1, %c0_i32 : i32, i32
  }
  func.func @transform_1(%arg0: i32, %arg1: i32) -> (i32, i32, i32) {
    %c0_i32 = arith.constant 0 : i32
    %c0_i32_0 = arith.constant 0 : i32
    %c0_i32_1 = arith.constant 0 : i32
    return %arg0, %c0_i32, %c0_i32_0 : i32, i32, i32
  }
}

</mosaic_0001>

<bundles_post_ra>
// kernel: tpu_custom_call.1
= control target key start
LH: loop header
LB: loop body
LE: loop exit
PB: predicated region body
PF: predicated region fallthrough
CT: control target
= control target key end

     0   :  { %6 = vsyncpa [#allocation3], 0  ;;  %s152_s0 = inlined_call_operand.hbm [shape: f32[16,128], index: 0, kind: input, shape index: {}]   ;;  %s153_s1 = inlined_call_operand.hbm [shape: f32[1,8,128], index: 1, kind: output, shape index: {}]  }
   0x1   :  { %7 = vsyncpa [#allocation4], 0  ;;  %s114_s6 = smov [#allocation2]   ;;  %s66_s10 = scalar_lea.hbm %s152_s0, 256 }
   0x2   :  { %s17_s7 = sshll.u32 %s114_s6, 4  ;;  %p67_p0 = scmp.ne.s32.totalorder %s152_s0, %s66_s10  ;;  %s18_s7 = int_to_ptr.vmem [resolvable:$true] %s17_s7 }
   0x3   :  { %p70_p1 = scmp.lt.u32.totalorder %s66_s10, %s152_s0 }
   0x5   :  { %p72_p2 = pnand %p70_p1, %p67_p0 }
   0x7   :  { %75 = shalt.err (!%p72_p2)
}
   0x8   :  { %s76_s15 = scalar_lea.vmem %s18_s7, 256  ;;  %p81_p4 = scmp.lt.s32.totalorder %s18_s7, %s18_s7 }
   0x9   :  { %p77_p3 = scmp.ne.s32.totalorder %s18_s7, %s76_s15  ;;  %p82_p5 = scmp.lt.s32.totalorder %s76_s15, %s76_s15 }
   0xb   :  { %p83_p6 = por %p82_p5, %p81_p4 }
   0xd   :  { %p84_p7 = pnand %p83_p6, %p77_p3 }
   0xf   :  { %87 = shalt.err (!%p84_p7)
}
  0x10   :  { %s115_s16 = smov 128   ;;  %s116_s17 = smov 8  }
  0x11   :  { %23 = dma.hbm_to_vmem [thread:$0]  %s152_s0, 256, %s18_s7, [#allocation3], %s115_s16, %s115_s16, %s116_s17  }
  0x12   :  { %110 = dma.done.wait [#allocation3], 256  }
  0x13   :  { %111 = vsyncadd [#allocation3], 4294967040  ;;  %v34_v0 = vld [vmem:[#allocation2] sm:$0xff]  ;;  %v35_v1 = vld [vmem:[#allocation2 + $0x8] sm:$0xff]  ;;  %s117_s20 = smov [#allocation5]  }
  0x14   :  { %v59_v2 = vadd.f32 -0.5, %v34_v0  ;;  %v60_v3 = vadd.f32 -0.5, %v35_v1  ;;  %s50_s21 = sshll.u32 %s117_s20, 4  ;;  %s51_s21 = int_to_ptr.vmem [resolvable:$true] %s50_s21 }
  0x15   :  { %s88_s22 = scalar_lea.vmem %s51_s21, 128  ;;  %p93_p9 = scmp.lt.s32.totalorder %s51_s21, %s51_s21 }
  0x16   :  { %v38_v4 = vand.u32 2147483647, %v59_v2  ;;  %v39_v5 = vand.u32 2147483647, %v60_v3  ;;  %p89_p8 = scmp.ne.s32.totalorder %s51_s21, %s88_s22  ;;  %p94_p10 = scmp.lt.s32.totalorder %s88_s22, %s88_s22 }
  0x18   :  { %v40_v6 = vadd.f32 %v39_v5, %v38_v4  ;;  %p95_p11 = por %p94_p10, %p93_p9 }
  0x1a   :  { %43 = vst [vmem:[#allocation5] sm:$0xff] %v40_v6  ;;  %p96_p12 = pnand %p95_p11, %p89_p8 }
  0x1c   :  { %99 = shalt.err (!%p96_p12)
}
  0x1d   :  { %s100_s24 = scalar_lea.hbm %s153_s1, 128 }
  0x1e   :  { %p101_p13 = scmp.ne.s32.totalorder %s153_s1, %s100_s24  ;;  %p104_p0 = scmp.lt.u32.totalorder %s100_s24, %s153_s1 }
  0x20   :  { %p106_p1 = pnand %p104_p0, %p101_p13 }
  0x22   :  { %109 = shalt.err (!%p106_p1)
}
  0x23   :  { %53 = dma.vmem_to_hbm [thread:$0]  %s51_s21, 128, %s153_s1, [#allocation4]  }
  0x24   :  { %112 = dma.done.wait [#allocation4], 128  }
  0x25   :  { %113 = vsyncadd [#allocation4], 4294967168 }
  0x26   :  { %57 = vsyncpa [#allocation3], 1 }
  0x27   :  { %58 = vsyncpa [#allocation4], 1 }

</bundles_post_ra>
